<compile_context>
chip_gen: v5e
topology: v5e:2x2
jax: 0.10.0
libtpu: 0.0.40
codegen_flags: <defaults>
</compile_context>

<pallas_src>
import functools

import jax
import jax.numpy as jnp
from jax.experimental import pallas as pl
from jax.experimental.pallas import tpu as pltpu


# Pre-folded video normalization constants:
#   gray_norm = ((0.299 r + 0.587 g + 0.114 b) / 255 - 0.421) / 0.165
_VSCALE = 1.0 / (255.0 * 0.165)
_CR = 0.299 * _VSCALE
_CG = 0.587 * _VSCALE
_CB = 0.114 * _VSCALE
_CBIAS = -0.421 / 0.165
_LN_EPS = 1e-5
_SPF = 640            # audio samples per video frame (rate_ratio == 640)


# ----------------------------------------------------------------------------
# Single fused kernel: video preproc + audio preproc + audiovisual model head.
# ----------------------------------------------------------------------------
def fused_pipeline_kernel(nsamp_ref, video_ref, wav_ref, wv_ref, wa_ref,
                          vbias_ref, wo_ref, o_ref, *, n_frames):
    # --- audio_process (mono mean over channels) + AudioTransform (test):
    #     layer_norm over the whole utterance (eps=1e-5), masked to the real length ---
    wav = wav_ref[...]                                  # (CH, Ttile, 640) f32
    mono = jnp.mean(wav, axis=0)                        # (Ttile, 640)
    t_tile, spf = mono.shape
    n = nsamp_ref[0]                                    # runtime length (SMEM scalar)
    row = jax.lax.broadcasted_iota(jnp.int32, mono.shape, 0)
    col = jax.lax.broadcasted_iota(jnp.int32, mono.shape, 1)
    valid = (row * spf + col) < n
    mono_v = jnp.where(valid, mono, 0.0)
    inv_n = 1.0 / n.astype(jnp.float32)
    # one-pass stats: the two reductions are independent (no mu -> var serialization)
    mu = jnp.sum(mono_v) * inv_n
    ex2 = jnp.sum(mono_v * mono_v) * inv_n
    var = ex2 - mu * mu
    norm = jnp.where(valid, (mono - mu) * jax.lax.rsqrt(var + _LN_EPS), 0.0)
    audio_feats = norm[:n_frames, :]                    # cut_or_pad AFTER layer_norm

    # --- VideoTransform (test) folded into the fusion matmul ---
    # /255 -> grayscale -> Normalize live in the pre-scaled wv rows + vbias, so the
    # uint8 video feeds the MXU directly: no transpose, no per-channel VPU pass,
    # no feature-scratch round trip. Two dots accumulate in f32.
    v = video_ref[...].astype(jnp.bfloat16)             # (T, H*W*C) u8 -> bf16 at MXU edge
    fused = jnp.dot(v, wv_ref[...], preferred_element_type=jnp.float32)
    fused += jnp.dot(audio_feats.astype(jnp.bfloat16), wa_ref[...],
                     preferred_element_type=jnp.float32)
    fused += vbias_ref[...]                              # grayscale-normalization bias (1,D)
    fused = jnp.maximum(fused, 0.0)                      # relu in f32 (v5e: no bf16 VPU)
    # TODO(synk): real ModelModule (conformer AVSR encoder + beam-search decode) is opaque
    #             in cfg; this deterministic fused projection head is a stand-in.
    o_ref[...] = jnp.dot(fused.astype(jnp.bfloat16), wo_ref[...],
                         preferred_element_type=jnp.float32)


def fused_pipeline_call(n_samples, video_flat, wav_tiled, wv_exp, wa, vbias, wo):
    T, HWC = video_flat.shape
    CH, t_tile, A = wav_tiled.shape
    Kv, D = wv_exp.shape
    _, V = wo.shape
    assert Kv == HWC and wa.shape == (A, D) and vbias.shape == (1, D) and t_tile >= T
    kernel = functools.partial(fused_pipeline_kernel, n_frames=T)
    # Total live data is < 1 MiB, so a single no-grid block keeps everything VMEM-resident
    # (no per-step pipeline overhead, no HBM round trips for intermediates).
    return pl.pallas_call(
        kernel,
        out_shape=jax.ShapeDtypeStruct((T, V), jnp.float32),
        in_specs=[
            pl.BlockSpec(memory_space=pltpu.MemorySpace.SMEM),   # n_samples (1,) i32
            pl.BlockSpec((T, HWC), lambda: (0, 0)),              # video u8
            pl.BlockSpec((CH, t_tile, A), lambda: (0, 0, 0)),    # waveform f32
            pl.BlockSpec((Kv, D), lambda: (0, 0)),               # wv_exp bf16
            pl.BlockSpec((A, D), lambda: (0, 0)),                # wa bf16
            pl.BlockSpec((1, D), lambda: (0, 0)),                # vbias f32
            pl.BlockSpec((D, V), lambda: (0, 0)),                # wo bf16
        ],
        out_specs=pl.BlockSpec((T, V), lambda: (0, 0)),
    )(n_samples, video_flat, wav_tiled, wv_exp, wa, vbias, wo)


# ----------------------------------------------------------------------------
# Model-load-time weight prep (hoisted off the per-call critical path).
# ----------------------------------------------------------------------------
def prepare_weights(wv, wa, wo):
    """Fold /255 + grayscale + Normalize into Wv rows, pre-cast everything to bf16."""
    F, D = wv.shape
    coef = jnp.array([_CR, _CG, _CB], jnp.float32)                    # RGB -> gray/norm
    wv_exp = (wv[:, None, :] * coef[None, :, None]).reshape(F * 3, D)  # (H*W*C, D)
    vbias = (_CBIAS * jnp.sum(wv, axis=0, keepdims=True)).astype(jnp.float32)  # (1, D)
    return (wv_exp.astype(jnp.bfloat16), wa.astype(jnp.bfloat16),
            vbias, wo.astype(jnp.bfloat16))


# ----------------------------------------------------------------------------
# End-to-end "forward": host-side layout plumbing only (free reshapes).
# ----------------------------------------------------------------------------
@jax.jit
def inference_pipeline(video_thwc_u8, waveform, n_samples, wv_exp, wa_b, vbias, wo_b):
    # load_video gives (T, H, W, C) uint8; the reference permute((0,3,1,2)) + grayscale
    # are folded into wv_exp/vbias, so the only video op here is a free contiguous reshape.
    T, H, W, C = video_thwc_u8.shape
    video_flat = video_thwc_u8.reshape(T, H * W * C)

    # load_audio gives (CH, N_buf); pad the buffer to whole 640-sample frames (>= T) so
    # the kernel sees a lane-dense (CH, Ttile, 640) tile. The real utterance length is
    # the runtime SMEM scalar n_samples, so all lengths reuse one compiled kernel.
    CH, n_buf = waveform.shape
    t_tile = max(T, -(-n_buf // _SPF))
    pad = t_tile * _SPF - n_buf
    wav = waveform
    if pad:
        wav = jnp.pad(wav, ((0, 0), (0, pad)))
    wav = wav.reshape(CH, t_tile, _SPF)

    return fused_pipeline_call(n_samples, video_flat, wav, wv_exp, wa_b, vbias, wo_b)


if __name__ == "__main__":
    key = jax.random.PRNGKey(0)
    k_vid, k_aud, k_wv, k_wa, k_wo = jax.random.split(key, 5)

    T, H, W, C = 8, 16, 16, 3
    n_buf = T * _SPF                                  # 5120-sample audio buffer
    n_real = n_buf - 130                              # ragged utterance (exercises masking)
    F, A, D, V = H * W, _SPF, 128, 128

    # synthetic "loaded" data (stands in for ffmpeg / torchvision.io.read_video outputs)
    video_u8 = jax.random.randint(k_vid, (T, H, W, C), 0, 256, jnp.int32).astype(jnp.uint8)
    waveform = jax.random.normal(k_aud, (2, n_buf), jnp.float32) * 0.1
    n_samples = jnp.array([n_real], jnp.int32)

    # deterministic synthetic model weights; prepared ONCE at "model load" time
    wv = jax.random.normal(k_wv, (F, D), jnp.float32) * 0.02
    wa = jax.random.normal(k_wa, (A, D), jnp.float32) * 0.02
    wo = jax.random.normal(k_wo, (D, V), jnp.float32) * 0.02
    wv_exp, wa_b, vbias, wo_b = prepare_weights(wv, wa, wo)

    out = inference_pipeline(video_u8, waveform, n_samples, wv_exp, wa_b, vbias, wo_b)
    jax.block_until_ready(out)
    assert out.shape == (T, V) and out.dtype == jnp.float32
    print("KERNEL_OK")
</pallas_src>

<mosaic_0001>
module attributes {stable_mosaic.version = 11 : i64} {
  func.func @fused_pipeline_kernel(%arg0: memref<1xi32, #tpu.memory_space<smem>>, %arg1: memref<8x768xi8, #tpu.memory_space<vmem>>, %arg2: memref<2x8x640xf32, #tpu.memory_space<vmem>>, %arg3: memref<768x128xbf16, #tpu.memory_space<vmem>>, %arg4: memref<640x128xbf16, #tpu.memory_space<vmem>>, %arg5: memref<1x128xf32, #tpu.memory_space<vmem>>, %arg6: memref<128x128xbf16, #tpu.memory_space<vmem>>, %arg7: memref<8x128xf32, #tpu.memory_space<vmem>>) attributes {dimension_semantics = [], scalar_prefetch = 0 : i64, scratch_operands = 0 : i64, tpu.core_type = #tpu.core_type<tc>} {
    %c0 = arith.constant 0 : index
    %c0_0 = arith.constant 0 : index
    %c0_1 = arith.constant 0 : index
    %0 = vector.load %arg2[%c0, %c0_0, %c0_1] : memref<2x8x640xf32, #tpu.memory_space<vmem>>, vector<2x8x640xf32>
    %cst = arith.constant dense<0.000000e+00> : vector<8x640xf32>
    %1 = vector.multi_reduction <add>, %0, %cst [0] : vector<2x8x640xf32> to vector<8x640xf32>
    %cst_2 = arith.constant 2.000000e+00 : f32
    %2 = vector.broadcast %cst_2 : f32 to vector<8x640xf32>
    %3 = arith.divf %1, %2 : vector<8x640xf32>
    %c0_3 = arith.constant 0 : index
    %4 = memref.load %arg0[%c0_3] : memref<1xi32, #tpu.memory_space<smem>>
    %5 = tpu.iota {dimensions = array<i32: 0>} : vector<8x640xi32>
    %6 = tpu.iota {dimensions = array<i32: 1>} : vector<8x640xi32>
    %c640_i32 = arith.constant 640 : i32
    %7 = vector.broadcast %c640_i32 : i32 to vector<8x640xi32>
    %8 = arith.muli %5, %7 : vector<8x640xi32>
    %9 = arith.addi %8, %6 : vector<8x640xi32>
    %10 = vector.broadcast %4 : i32 to vector<8x640xi32>
    %11 = arith.cmpi slt, %9, %10 : vector<8x640xi32>
    %cst_4 = arith.constant 0.000000e+00 : f32
    %12 = vector.broadcast %cst_4 : f32 to vector<8x640xf32>
    %13 = arith.select %11, %3, %12 : vector<8x640xi1>, vector<8x640xf32>
    %14 = arith.sitofp %4 : i32 to f32
    %cst_5 = arith.constant 1.000000e+00 : f32
    %15 = arith.divf %cst_5, %14 : f32
    %16 = vector.shape_cast %13 : vector<8x640xf32> to vector<1x8x640xf32>
    %cst_6 = arith.constant dense<0.000000e+00> : vector<1xf32>
    %17 = vector.multi_reduction <add>, %16, %cst_6 [1, 2] : vector<1x8x640xf32> to vector<1xf32>
    %18 = vector.shape_cast %17 : vector<1xf32> to vector<1x1x1xf32>
    %19 = vector.extract %18[0, 0, 0] : f32 from vector<1x1x1xf32>
    %20 = arith.mulf %19, %15 : f32
    %21 = arith.mulf %13, %13 : vector<8x640xf32>
    %22 = vector.shape_cast %21 : vector<8x640xf32> to vector<1x8x640xf32>
    %cst_7 = arith.constant dense<0.000000e+00> : vector<1xf32>
    %23 = vector.multi_reduction <add>, %22, %cst_7 [1, 2] : vector<1x8x640xf32> to vector<1xf32>
    %24 = vector.shape_cast %23 : vector<1xf32> to vector<1x1x1xf32>
    %25 = vector.extract %24[0, 0, 0] : f32 from vector<1x1x1xf32>
    %26 = arith.mulf %25, %15 : f32
    %27 = arith.mulf %20, %20 : f32
    %28 = arith.subf %26, %27 : f32
    %29 = vector.broadcast %20 : f32 to vector<8x640xf32>
    %30 = arith.subf %3, %29 : vector<8x640xf32>
    %cst_8 = arith.constant 9.99999974E-6 : f32
    %31 = arith.addf %28, %cst_8 : f32
    %32 = math.rsqrt %31 : f32
    %33 = vector.broadcast %32 : f32 to vector<8x640xf32>
    %34 = arith.mulf %30, %33 : vector<8x640xf32>
    %cst_9 = arith.constant 0.000000e+00 : f32
    %35 = vector.broadcast %cst_9 : f32 to vector<8x640xf32>
    %36 = arith.select %11, %34, %35 : vector<8x640xi1>, vector<8x640xf32>
    %c0_10 = arith.constant 0 : index
    %c0_11 = arith.constant 0 : index
    %37 = vector.load %arg1[%c0_10, %c0_11] : memref<8x768xi8, #tpu.memory_space<vmem>>, vector<8x768xi8>
    %38 = arith.uitofp %37 : vector<8x768xi8> to vector<8x768xbf16>
    %c0_12 = arith.constant 0 : index
    %c0_13 = arith.constant 0 : index
    %39 = vector.load %arg3[%c0_12, %c0_13] : memref<768x128xbf16, #tpu.memory_space<vmem>>, vector<768x128xbf16>
    %cst_14 = arith.constant dense<0.000000e+00> : vector<8x128xf32>
    %40 = tpu.matmul %38, %39, %cst_14 {dimension_numbers = #tpu.dot_dimension_numbers<[1], [0], [0], [1], [0, 0, 1, 1], [], []>} : vector<8x768xbf16>, vector<768x128xbf16>, vector<8x128xf32> -> vector<8x128xf32>
    %41 = arith.truncf %36 : vector<8x640xf32> to vector<8x640xbf16>
    %c0_15 = arith.constant 0 : index
    %c0_16 = arith.constant 0 : index
    %42 = vector.load %arg4[%c0_15, %c0_16] : memref<640x128xbf16, #tpu.memory_space<vmem>>, vector<640x128xbf16>
    %cst_17 = arith.constant dense<0.000000e+00> : vector<8x128xf32>
    %43 = tpu.matmul %41, %42, %cst_17 {dimension_numbers = #tpu.dot_dimension_numbers<[1], [0], [0], [1], [0, 0, 1, 1], [], []>} : vector<8x640xbf16>, vector<640x128xbf16>, vector<8x128xf32> -> vector<8x128xf32>
    %44 = arith.addf %40, %43 : vector<8x128xf32>
    %c0_18 = arith.constant 0 : index
    %c0_19 = arith.constant 0 : index
    %45 = vector.load %arg5[%c0_18, %c0_19] : memref<1x128xf32, #tpu.memory_space<vmem>>, vector<1x128xf32>
    %46 = vector.broadcast %45 : vector<1x128xf32> to vector<8x128xf32>
    %47 = arith.addf %44, %46 : vector<8x128xf32>
    %cst_20 = arith.constant 0.000000e+00 : f32
    %48 = vector.broadcast %cst_20 : f32 to vector<8x128xf32>
    %49 = arith.maximumf %47, %48 : vector<8x128xf32>
    %50 = arith.truncf %49 : vector<8x128xf32> to vector<8x128xbf16>
    %c0_21 = arith.constant 0 : index
    %c0_22 = arith.constant 0 : index
    %51 = vector.load %arg6[%c0_21, %c0_22] : memref<128x128xbf16, #tpu.memory_space<vmem>>, vector<128x128xbf16>
    %cst_23 = arith.constant dense<0.000000e+00> : vector<8x128xf32>
    %52 = tpu.matmul %50, %51, %cst_23 {dimension_numbers = #tpu.dot_dimension_numbers<[1], [0], [0], [1], [0, 0, 1, 1], [], []>} : vector<8x128xbf16>, vector<128x128xbf16>, vector<8x128xf32> -> vector<8x128xf32>
    %c0_24 = arith.constant 0 : index
    %c0_25 = arith.constant 0 : index
    %53 = vector.load %arg7[%c0_24, %c0_25] : memref<8x128xf32, #tpu.memory_space<vmem>>, vector<8x128xf32>
    tpu.vector_store %arg7[%c0_24, %c0_25], %52 {strides = array<i32>} : memref<8x128xf32, #tpu.memory_space<vmem>>, vector<8x128xf32>,
    return
  }
}

</mosaic_0001>

<bundles_post_ra>
// kernel: inference_pipeline.1
= control target key start
LH: loop header
LB: loop body
LE: loop exit
PB: predicated region body
PF: predicated region fallthrough
CT: control target
= control target key end

     0   :  { %v56_v0 = vlaneseq  ;;  %v1680_v1 = vmov 2.0   ;;  %s2152_s0 = inlined_call_operand.<no memory space> [shape: s32[1], index: 0, kind: input, shape index: {}]   ;;  %s2153_s1 = inlined_call_operand.vmem [shape: u8[8,768], index: 1, kind: input, shape index: {}]   ;;  %s2154_s2 = inlined_call_operand.vmem [shape: f32[2,8,640], index: 2, kind: input, shape index: {}]   ;;  %s2155_s3 = inlined_call_operand.vmem [shape: bf16[768,128], index: 3, kind: input, shape index: {}]   ;;  %s2156_s4 = inlined_call_operand.vmem [shape: bf16[640,128], index: 4, kind: input, shape index: {}]   ;;  %s2157_s5 = inlined_call_operand.vmem [shape: f32[1,128], index: 5, kind: input, shape index: {}]   ;;  %s2158_s6 = inlined_call_operand.vmem [shape: bf16[128,128], index: 6, kind: input, shape index: {}]   ;;  %s2159_s7 = inlined_call_operand.hbm [shape: f32[8,128], index: 7, kind: output, shape index: {}]  }
   0x1   :  { %1648 = vrcp.f32 %v1680_v1 }
   0x2   :  { %13 = vsyncpa [#allocation4], 0  ;;  %v57_v2 = vshrl.u32 %v56_v0, 7  ;;  %v59_v3 = vand.u32 127, %v56_v0  ;;  %v28_v5 = vld [vmem:[%s2154_s2] sm:$0xff]  ;;  %v33_v6 = vld [vmem:[%s2154_s2 + $0x28] sm:$0xff]  ;;  %v1749_v21 = vstv %s2152_s0  ;;  %s81_s24 = scvt.s32.f32 %s2152_s0 }
   0x3   :  { %v29_v11 = vld [vmem:[%s2154_s2 + $0x8] sm:$0xff]  ;;  %v30_v12 = vld [vmem:[%s2154_s2 + $0x10] sm:$0xff]  ;;  %v31_v13 = vld [vmem:[%s2154_s2 + $0x18] sm:$0xff]  ;;  %v38_v19 = vadd.f32 %v33_v6, %v28_v5  ;;  %s1681_s28 = smov [#allocation3]   ;;  %s1133_s10 = sshll.u32 %s2159_s7, 4  ;;  %s1134_s10 = int_to_ptr.hbm [resolvable:$true] %s1133_s10 }
   0x4   :  { %v60_v8 = vadd.s32 128, %v59_v3  ;;  %v61_v9 = vadd.s32 256, %v59_v3  ;;  %v64_v10 = vmul.u32 640, %v57_v2  ;;  %v34_v14 = vld [vmem:[%s2154_s2 + $0x30] sm:$0xff]  ;;  %v35_v15 = vld [vmem:[%s2154_s2 + $0x38] sm:$0xff]  ;;  %v36_v16 = vld [vmem:[%s2154_s2 + $0x40] sm:$0xff]  ;;  %v82_v59 = vstv %s81_s24 }
   0x5   :  { %v62_v18 = vadd.s32 384, %v59_v3  ;;  %v63_v20 = vadd.s32 512, %v59_v3  ;;  %v32_v22 = vld [vmem:[%s2154_s2 + $0x20] sm:$0xff]  ;;  %v37_v23 = vld [vmem:[%s2154_s2 + $0x48] sm:$0xff]  ;;  %v39_v28 = vadd.f32 %v34_v14, %v29_v11  ;;  %v40_v29 = vadd.f32 %v35_v15, %v30_v12  ;;  %s1131_s29 = sshll.u32 %s1681_s28, 4  ;;  %s1132_s29 = int_to_ptr.vmem [resolvable:$true] %s1131_s29 }
   0x6   :  { %v1757_v25 = vadd.s32 %v64_v10, %v59_v3  ;;  %v1759_v26 = vadd.s32 %v64_v10, %v60_v8  ;;  %v1761_v27 = vadd.s32 %v64_v10, %v61_v9  ;;  %v41_v30 = vadd.f32 %v36_v16, %v31_v13 }
   0x7   :  { %v1649_v4 = vpop.eup %1648  ;;  %v1763_v32 = vadd.s32 %v64_v10, %v62_v18  ;;  %v42_v33 = vadd.f32 %v37_v23, %v32_v22  ;;  %v1765_v34 = vadd.s32 %v64_v10, %v63_v20  ;;  %1650 = vrcp.f32 %v82_v59  ;;  %v1596_v20 = vld [vmem:[%s2156_s4 + $0x38] sm:$0xff] }
   0x8   :  { %v44_v7 = vmul.f32 2.0, %v1649_v4  ;;  %vm48_vm0 = vweird.f32 %v1649_v4  ;;  %vm71_vm1 = vcmp.lt.s32.totalorder %v1757_v25, %v1749_v21  ;;  %vm72_vm2 = vcmp.lt.s32.totalorder %v1759_v26, %v1749_v21  ;;  %v1604_v22 = vld [vmem:[%s2156_s4 + $0x78] sm:$0xff]  ;;  %610 = vmatpush.bf16.msra.mxu0 %v1596_v20  ;;  %v1553_v20 = vld [vmem:[%s2155_s3 + $0x60] sm:$0xff] }
   0x9   :  { %vm73_vm3 = vcmp.lt.s32.totalorder %v1761_v27, %v1749_v21  ;;  %vm74_vm4 = vcmp.lt.s32.totalorder %v1763_v32, %v1749_v21  ;;  %vm75_vm5 = vcmp.lt.s32.totalorder %v1765_v34, %v1749_v21  ;;  %v94_v0 = vand.u32 2147483648, %v82_v59  ;;  %v1612_v23 = vld [vmem:[%s2156_s4 + $0xb8] sm:$0xff]  ;;  %623 = vmatpush.bf16.msra.mxu1 %v1604_v22  ;;  %vm2014_vm13 = vmpackc.low %vm71_vm1, %vm71_vm1 }
   0xa   :  { %v45_v17 = vsub.f32 1.0, %v44_v7  ;;  %vm88_vm6 = vweird.f32 %v82_v59  ;;  %v92_v2 = vand.u32 2147483647, %v82_v59  ;;  %636 = vmatpush.bf16.msra.mxu2 %v1612_v23  ;;  %v1624_v22 = vld [vmem:[%s2156_s4 + $0x118] sm:$0xff]  ;;  %vm1305_vm14 = vmpackc.low %vm72_vm2, %vm72_vm2 }
   0xb   :  { %v95_v3 = vor.u32 1.1754944e-38, %v94_v0  ;;  %v1605_v0 = vld [vmem:[%s2156_s4 + $0x80] sm:$0xff]  ;;  %v1544_v23 = vld [vmem:[%s2155_s3 + $0x18] sm:$0xff]  ;;  %vm1308_vm15 = vmpackc.low %vm73_vm3, %vm73_vm3 }
   0xc   :  { %v46_v24 = vmul.f32 %v1649_v4, %v45_v17  ;;  %vm93_vm9 = vcmp.eq.f32.partialorder %v92_v2, 8.507059e+37  ;;  %v1548_v2 = vld [vmem:[%s2155_s3 + $0x38] sm:$0xff] }
   0xd   :  { %v1651_v60 = vpop.eup %1650  ;;  %v1572_v26 = vld [vmem:[%s2155_s3 + $0xf8] sm:$0xff] }
   0xe   :  { %v47_v31 = vadd.f32 %v1649_v4, %v46_v24  ;;  %v84_v61 = vmul.f32 %v1651_v60, %v82_v59  ;;  %vm89_vm7 = vweird.f32 %v1651_v60  ;;  %v1595_v24 = vld [vmem:[%s2156_s4 + $0x30] sm:$0xff]  ;;  %v1580_v27 = vld [vmem:[%s2155_s3 + $0x138] sm:$0xff] }
   0xf   :  { %vm90_vm8 = vmor %vm88_vm6, %vm89_vm7  ;;  %611 = vmatpush.bf16.msra.mxu0 %v1595_v24  ;;  %v1552_v24 = vld [vmem:[%s2155_s3 + $0x58] sm:$0xff] }
  0x10   :  { %v49_v35 = vsel %vm48_vm0, %v1649_v4, %v47_v31  ;;  %v85_v62 = vsub.f32 1.0, %v84_v61  ;;  %v1602_v31 = vld [vmem:[%s2156_s4 + $0x68] sm:$0xff]  ;;  %v1589_v61 = vld [vmem:[%s2156_s4] sm:$0xff]  ;;  %vm1311_vm0 = vmpackc.low %vm74_vm4, %vm74_vm4 }
  0x11   :  { %v1773_v36 = vmul.f32 %v49_v35, %v38_v19  ;;  %v1775_v37 = vmul.f32 %v49_v35, %v39_v28  ;;  %v1777_v38 = vmul.f32 %v49_v35, %v40_v29  ;;  %v1779_v39 = vmul.f32 %v49_v35, %v41_v30  ;;  %v1603_v28 = vld [vmem:[%s2156_s4 + $0x70] sm:$0xff]  ;;  %v1594_v30 = vld [vmem:[%s2156_s4 + $0x28] sm:$0xff]  ;;  %v1584_v21 = vld [vmem:[%s2155_s3 + $0x158] sm:$0xff] }
  0x12   :  { %v1783_v40 = vmul.f32 %v49_v35, %v42_v33  ;;  %v86_v63 = vmul.f32 %v1651_v60, %v85_v62  ;;  %v1611_v29 = vld [vmem:[%s2156_s4 + $0xb0] sm:$0xff]  ;;  %624 = vmatpush.bf16.msra.mxu1 %v1603_v28  ;;  %v1610_v33 = vld [vmem:[%s2156_s4 + $0xa8] sm:$0xff]  ;;  %v1620_v35 = vld [vmem:[%s2156_s4 + $0xf8] sm:$0xff] }
  0x13   :  { %v76_v41 = vsel %vm71_vm1, %v1773_v36, 0.0  ;;  %v77_v42 = vsel %vm72_vm2, %v1775_v37, 0.0  ;;  %v78_v43 = vsel %vm73_vm3, %v1777_v38, 0.0  ;;  %v79_v47 = vsel %vm74_vm4, %v1779_v39, 0.0  ;;  %637 = vmatpush.bf16.msra.mxu2 %v1611_v29  ;;  %649 = vmatpush.bf16.msra.mxu3 %v1620_v35  ;;  %v1597_v62 = vld [vmem:[%s2156_s4 + $0x40] sm:$0xff]  ;;  %v1623_v28 = vld [vmem:[%s2156_s4 + $0x110] sm:$0xff]  ;;  %vm1314_vm1 = vmpackc.low %vm75_vm5, %vm75_vm5 }
  0x14   :  { %v98_v44 = vadd.f32 %v77_v42, %v76_v41  ;;  %v112_v45 = vmul.f32 %v76_v41, %v76_v41  ;;  %v113_v46 = vmul.f32 %v77_v42, %v77_v42  ;;  %v114_v48 = vmul.f32 %v78_v43, %v78_v43  ;;  %v1619_v41 = vld [vmem:[%s2156_s4 + $0xf0] sm:$0xff]  ;;  %612 = vmatpush.bf16.msra.mxu0 %v1594_v30  ;;  %v1593_v42 = vld [vmem:[%s2156_s4 + $0x20] sm:$0xff]  ;;  %v1542_v35 = vld [vmem:[%s2155_s3 + $0x8] sm:$0xff] }
  0x15   :  { %v80_v51 = vsel %vm75_vm5, %v1783_v40, 0.0  ;;  %v115_v53 = vmul.f32 %v79_v47, %v79_v47  ;;  %v87_v1 = vadd.f32 %v1651_v60, %v86_v63  ;;  %v1543_v29 = vld [vmem:[%s2155_s3 + $0x10] sm:$0xff] }
  0x16   :  { %v99_v49 = vadd.f32 %v98_v44, %v78_v43  ;;  %v117_v50 = vadd.f32 %v113_v46, %v112_v45  ;;  %v116_v56 = vmul.f32 %v80_v51, %v80_v51  ;;  %625 = vmatpush.bf16.msra.mxu1 %v1602_v31  ;;  %v1601_v43 = vld [vmem:[%s2156_s4 + $0x60] sm:$0xff]  ;;  %v1618_v45 = vld [vmem:[%s2156_s4 + $0xe8] sm:$0xff]  ;;  %v1592_v46 = vld [vmem:[%s2156_s4 + $0x18] sm:$0xff] }
  0x17   :  { %v91_v4 = vsel %vm90_vm8, %v1651_v60, %v87_v1  ;;  %638 = vmatpush.bf16.msra.mxu2 %v1610_v33  ;;  %v1609_v44 = vld [vmem:[%s2156_s4 + $0xa0] sm:$0xff]  ;;  %650 = vmatpush.bf16.msra.mxu3 %v1619_v41  ;;  %v1615_v60 = vld [vmem:[%s2156_s4 + $0xd0] sm:$0xff]  ;;  %v1628_v1 = vld [vmem:[%s2156_s4 + $0x138] sm:$0xff] }
  0x18   :  { %v100_v52 = vadd.f32 %v99_v49, %v79_v47  ;;  %v118_v54 = vadd.f32 %v117_v50, %v114_v48  ;;  %v96_v5 = vsel %vm93_vm9, %v95_v3, %v91_v4  ;;  %613 = vmatpush.bf16.msra.mxu0 %v1593_v42  ;;  %v1600_v47 = vld [vmem:[%s2156_s4 + $0x58] sm:$0xff]  ;;  %v1617_v50 = vld [vmem:[%s2156_s4 + $0xe0] sm:$0xff]  ;;  %v1551_v30 = vld [vmem:[%s2155_s3 + $0x50] sm:$0xff] }
  0x19   :  { %1637 = vpush %v96_v5  ;;  %v1608_v48 = vld [vmem:[%s2156_s4 + $0x98] sm:$0xff]  ;;  %v1614_v5 = vld [vmem:[%s2156_s4 + $0xc8] sm:$0xff]  ;;  %v1561_v42 = vld [vmem:[%s2155_s3 + $0xa0] sm:$0xff] }
  0x1a   :  { %v101_v55 = vadd.f32 %v100_v52, %v80_v51  ;;  %v119_v57 = vadd.f32 %v118_v54, %v115_v53  ;;  %626 = vmatpush.bf16.msra.mxu1 %v1601_v43  ;;  %v1591_v51 = vld [vmem:[%s2156_s4 + $0x10] sm:$0xff]  ;;  %v1616_v54 = vld [vmem:[%s2156_s4 + $0xd8] sm:$0xff]  ;;  %v1562_v31 = vld [vmem:[%s2155_s3 + $0xa8] sm:$0xff] }
  0x1b   :  { %639 = vmatpush.bf16.msra.mxu2 %v1609_v44  ;;  %651 = vmatpush.bf16.msra.mxu3 %v1618_v45  ;;  %v1599_v52 = vld [vmem:[%s2156_s4 + $0x50] sm:$0xff]  ;;  %v1556_v3 = vld [vmem:[%s2155_s3 + $0x78] sm:$0xff]  ;;  %v1622_v33 = vld [vmem:[%s2156_s4 + $0x108] sm:$0xff] }
  0x1c   :  { %102 = vadd.xlane.f32.xlu0 %v101_v55  ;;  %v120_v58 = vadd.f32 %v119_v57, %v116_v56  ;;  %614 = vmatpush.bf16.msra.mxu0 %v1592_v46  ;;  %v1607_v53 = vld [vmem:[%s2156_s4 + $0x90] sm:$0xff]  ;;  %v1590_v55 = vld [vmem:[%s2156_s4 + $0x8] sm:$0xff]  ;;  %v1621_v43 = vld [vmem:[%s2156_s4 + $0x100] sm:$0xff] }
  0x1d   :  { %v1598_v56 = vld [vmem:[%s2156_s4 + $0x48] sm:$0xff]  ;;  %v1541_v44 = vld [vmem:[%s2155_s3] sm:$0xff]  ;;  %v1560_v46 = vld [vmem:[%s2155_s3 + $0x98] sm:$0xff] }
  0x1e   :  { %627 = vmatpush.bf16.msra.mxu1 %v1600_v47  ;;  %v1606_v57 = vld [vmem:[%s2156_s4 + $0x88] sm:$0xff]  ;;  %v1549_v45 = vld [vmem:[%s2155_s3 + $0x40] sm:$0xff]  ;;  %v1559_v47 = vld [vmem:[%s2155_s3 + $0x90] sm:$0xff] }
  0x1f   :  { %640 = vmatpush.bf16.msra.mxu2 %v1608_v48  ;;  %652 = vmatpush.bf16.msra.mxu3 %v1617_v50  ;;  %v1550_v41 = vld [vmem:[%s2155_s3 + $0x48] sm:$0xff] }
  0x20   :  { %615 = vmatpush.bf16.msra.mxu0 %v1591_v51  ;;  %v1558_v48 = vld [vmem:[%s2155_s3 + $0x88] sm:$0xff] }
  0x22   :  { %628 = vmatpush.bf16.msra.mxu1 %v1599_v52 }
  0x23   :  { %641 = vmatpush.bf16.msra.mxu2 %v1607_v53  ;;  %653 = vmatpush.bf16.msra.mxu3 %v1616_v54 }
  0x24   :  { %121 = vadd.xlane.f32.xlu0 %v120_v58  ;;  %616 = vmatpush.bf16.msra.mxu0 %v1590_v55  ;;  %v1635_v55 = vld [vmem:[%s2158_s6 + $0x30] sm:$0xff] }
  0x26   :  { %629 = vmatpush.bf16.msra.mxu1 %v1598_v56 }
  0x27   :  { %642 = vmatpush.bf16.msra.mxu2 %v1606_v57  ;;  %654 = vmatpush.bf16.msra.mxu3 %v1615_v60 }
  0x28   :  { %617 = vmatpush.bf16.msra.mxu0 %v1589_v61  ;;  %v1588_v61 = vld [vmem:[%s2155_s3 + $0x178] sm:$0xff] }
  0x2a   :  { %630 = vmatpush.bf16.msra.mxu1 %v1597_v62 }
  0x2b   :  { %643 = vmatpush.bf16.msra.mxu2 %v1605_v0  ;;  %655 = vmatpush.bf16.msra.mxu3 %v1614_v5  ;;  %v1571_v0 = vld [vmem:[%s2155_s3 + $0xf0] sm:$0xff] }
  0x2c   :  { %662 = vmatpush.bf16.msrb.mxu0 %v1628_v1  ;;  %v1579_v1 = vld [vmem:[%s2155_s3 + $0x130] sm:$0xff] }
  0x2e   :  { %963 = vmatpush.bf16.msrb.mxu1 %v1548_v2  ;;  %v1587_v2 = vld [vmem:[%s2155_s3 + $0x170] sm:$0xff] }
  0x2f   :  { %976 = vmatpush.bf16.msrb.mxu2 %v1556_v3 }
  0x4a   :  { %s1638_s30 = spop %1637 }
  0x8f   :  { %v103_v6 = vpop.xlane.xlu0 %102 }
  0x90   :  { %v104_v7 = vrot.slane %v103_v6, 4 }
  0x92   :  { %v105_v8 = vadd.f32 %v104_v7, %v103_v6  ;;  %v1627_v7 = vld [vmem:[%s2156_s4 + $0x130] sm:$0xff] }
  0x93   :  { %663 = vmatpush.bf16.msrb.mxu0 %v1627_v7  ;;  %v1578_v7 = vld [vmem:[%s2155_s3 + $0x128] sm:$0xff] }
  0x94   :  { %v106_v9 = vrot.slane %v105_v8, 2 }
  0x96   :  { %v107_v10 = vadd.f32 %v106_v9, %v105_v8  ;;  %v1547_v8 = vld [vmem:[%s2155_s3 + $0x30] sm:$0xff] }
  0x97   :  { %v122_v11 = vpop.xlane.xlu0 %121  ;;  %v1555_v9 = vld [vmem:[%s2155_s3 + $0x70] sm:$0xff]  ;;  %964 = vmatpush.bf16.msrb.mxu1 %v1547_v8  ;;  %v1586_v8 = vld [vmem:[%s2155_s3 + $0x168] sm:$0xff] }
  0x98   :  { %v123_v12 = vrot.slane %v122_v11, 4  ;;  %v108_v13 = vrot.slane %v107_v10, 1  ;;  %977 = vmatpush.bf16.msrb.mxu2 %v1555_v9 }
  0x9a   :  { %v124_v14 = vadd.f32 %v123_v12, %v122_v11  ;;  %v109_v15 = vadd.f32 %v108_v13, %v107_v10  ;;  %v1613_v11 = vld [vmem:[%s2156_s4 + $0xc0] sm:$0xff]  ;;  %v1564_v12 = vld [vmem:[%s2155_s3 + $0xb8] sm:$0xff] }
  0x9b   :  { %656 = vmatpush.bf16.msra.mxu3 %v1613_v11 }
  0x9c   :  { %v125_v16 = vrot.slane %v124_v14, 2  ;;  %1639 = vpush %v109_v15  ;;  %v1546_v15 = vld [vmem:[%s2155_s3 + $0x28] sm:$0xff] }
  0x9d   :  { %965 = vmatpush.bf16.msrb.mxu1 %v1546_v15  ;;  %v1577_v15 = vld [vmem:[%s2155_s3 + $0x120] sm:$0xff] }
  0x9e   :  { %v126_v17 = vadd.f32 %v125_v16, %v124_v14  ;;  %v1626_v14 = vld [vmem:[%s2156_s4 + $0x128] sm:$0xff] }
  0x9f   :  { %v1554_v16 = vld [vmem:[%s2155_s3 + $0x68] sm:$0xff]  ;;  %989 = vmatpush.bf16.msrb.mxu3 %v1564_v12  ;;  %664 = vmatpush.bf16.msrb.mxu0 %v1626_v14  ;;  %v1569_v14 = vld [vmem:[%s2155_s3 + $0xe0] sm:$0xff] }
  0xa0   :  { %v127_v18 = vrot.slane %v126_v17, 1  ;;  %978 = vmatpush.bf16.msrb.mxu2 %v1554_v16  ;;  %v1585_v16 = vld [vmem:[%s2155_s3 + $0x160] sm:$0xff] }
  0xa2   :  { %v128_v19 = vadd.f32 %v127_v18, %v126_v17  ;;  %v1563_v17 = vld [vmem:[%s2155_s3 + $0xb0] sm:$0xff]  ;;  %v1625_v18 = vld [vmem:[%s2156_s4 + $0x120] sm:$0xff] }
  0xa3   :  { %990 = vmatpush.bf16.msrb.mxu3 %v1563_v17  ;;  %665 = vmatpush.bf16.msrb.mxu0 %v1625_v18 }
  0xa4   :  { %1641 = vpush %v128_v19  ;;  %v1545_v19 = vld [vmem:[%s2155_s3 + $0x20] sm:$0xff]  ;;  %979 = vmatpush.bf16.msrb.mxu2 %v1553_v20  ;;  %v1568_v20 = vld [vmem:[%s2155_s3 + $0xd8] sm:$0xff] }
  0xa5   :  { %966 = vmatpush.bf16.msrb.mxu1 %v1545_v19 }
  0xa7   :  { %666 = vmatpush.bf16.msrb.mxu0 %v1624_v22  ;;  %991 = vmatpush.bf16.msrb.mxu3 %v1562_v31  ;;  %v1576_v22 = vld [vmem:[%s2155_s3 + $0x118] sm:$0xff]  ;;  %v1583_v31 = vld [vmem:[%s2155_s3 + $0x150] sm:$0xff] }
  0xa8   :  { %980 = vmatpush.bf16.msrb.mxu2 %v1552_v24 }
  0xa9   :  { %967 = vmatpush.bf16.msrb.mxu1 %v1544_v23  ;;  %v164_v23 = vld [vmem:[%s2153_s1 + $0x8] sm:$0xf] }
  0xaa   :  { %v169_v24 = vunpack.c.0.s8 %v164_v23 }
  0xab   :  { %667 = vmatpush.bf16.msrb.mxu0 %v1623_v28  ;;  %992 = vmatpush.bf16.msrb.mxu3 %v1561_v42  ;;  %v1567_v28 = vld [vmem:[%s2155_s3 + $0xd0] sm:$0xff]  ;;  %v1574_v42 = vld [vmem:[%s2155_s3 + $0x108] sm:$0xff] }
  0xac   :  { %981 = vmatpush.bf16.msrb.mxu2 %v1551_v30  ;;  %v170_v30 = vunpack.c.1.s8 %v164_v23 }
  0xad   :  { %968 = vmatpush.bf16.msrb.mxu1 %v1543_v29  ;;  %v1575_v29 = vld [vmem:[%s2155_s3 + $0x110] sm:$0xff] }
  0xaf   :  { %668 = vmatpush.bf16.msrb.mxu0 %v1622_v33  ;;  %993 = vmatpush.bf16.msrb.mxu3 %v1560_v46 }
  0xb0   :  { %982 = vmatpush.bf16.msrb.mxu2 %v1550_v41  ;;  %v1566_v41 = vld [vmem:[%s2155_s3 + $0xc8] sm:$0xff] }
  0xb1   :  { %969 = vmatpush.bf16.msrb.mxu1 %v1542_v35  ;;  %v175_v35 = vand.u32 255, %v169_v24 }
  0xb3   :  { %669 = vmatpush.bf16.msrb.mxu0 %v1621_v43  ;;  %994 = vmatpush.bf16.msrb.mxu3 %v1559_v47  ;;  %v176_v43 = vand.u32 255, %v170_v30  ;;  %v181_v46 = vcvt.s32.f32 %v175_v35  ;;  %v1565_v47 = vld [vmem:[%s2155_s3 + $0xc0] sm:$0xff] }
  0xb4   :  { %983 = vmatpush.bf16.msrb.mxu2 %v1549_v45 }
  0xb5   :  { %970 = vmatpush.bf16.msrb.mxu1 %v1541_v44  ;;  %v1582_v44 = vld [vmem:[%s2155_s3 + $0x148] sm:$0xff] }
  0xb7   :  { %995 = vmatpush.bf16.msrb.mxu3 %v1558_v48  ;;  %v1573_v48 = vld [vmem:[%s2155_s3 + $0x100] sm:$0xff] }
  0xcd   :  { %s1640_s8 = spop %1639 }
  0xce   :  { %s1828_s15 = smul.f32 %s1640_s8, %s1638_s30 }
  0xd0   :  { %s131_s0 = smul.f32 %s1828_s15, %s1828_s15  ;;  %v133_v50 = vstv %s1828_s15 }
  0xd1   :  { %v134_v51 = vsub.f32 %v1773_v36, %v133_v50  ;;  %v135_v52 = vsub.f32 %v1775_v37, %v133_v50  ;;  %v136_v53 = vsub.f32 %v1777_v38, %v133_v50  ;;  %v137_v56 = vsub.f32 %v1779_v39, %v133_v50  ;;  %v2030_v37 = vld [vmem:[%s2153_s1] sm:$0xff] }
  0xd2   :  { %v165_v32 = vunpack.c.0.s8 %v2030_v37  ;;  %v166_v62 = vunpack.c.1.s8 %v2030_v37  ;;  %v138_v9 = vsub.f32 %v1783_v40, %v133_v50  ;;  %v168_v34 = vunpack.c.3.s8 %v2030_v37  ;;  %v1581_v50 = vld [vmem:[%s2155_s3 + $0x140] sm:$0xff] }
  0xd4   :  { %v171_v3 = vand.u32 255, %v165_v32  ;;  %v174_v33 = vand.u32 255, %v168_v34 }
  0xd5   :  { %s1642_s25 = spop %1641 }
  0xd6   :  { %s130_s8 = smul.f32 %s1642_s25, %s1638_s30  ;;  %v180_v45 = vcvt.s32.f32 %v174_v33 }
  0xd8   :  { %s132_s11 = ssub.f32 %s130_s8, %s131_s0 }
  0xda   :  { %s139_s30 = sadd.f32 1e-05, %s132_s11 }
  0xdc   :  { %v140_v49 = vstv %s139_s30 }
  0xdd   :  { %1652 = vrsqrt.f32 %v140_v49  ;;  %vm147_vm11 = vweird.f32 %v140_v49 }
  0xe3   :  { %v1653_v58 = vpop.eup %1652 }
  0xe4   :  { %v142_v59 = vmul.f32 %v1653_v58, %v140_v49  ;;  %vm148_vm10 = vweird.f32 %v1653_v58  ;;  %v1557_v49 = vld [vmem:[%s2155_s3 + $0x80] sm:$0xff] }
  0xe5   :  { %vm149_vm12 = vmor %vm147_vm11, %vm148_vm10  ;;  %996 = vmatpush.bf16.msrb.mxu3 %v1557_v49  ;;  %v182_v49 = vcvt.s32.f32 %v176_v43 }
  0xe6   :  { %v143_v63 = vmul.f32 %v1653_v58, %v142_v59 }
  0xe8   :  { %v144_v4 = vmul.f32 0.5, %v143_v63  ;;  %v167_v63 = vunpack.c.2.s8 %v2030_v37  ;;  %v1631_v37 = vld [vmem:[%s2158_s6 + $0x10] sm:$0xff] }
  0xea   :  { %v145_v6 = vsub.f32 1.5, %v144_v4  ;;  %v172_v4 = vand.u32 255, %v166_v62  ;;  %v173_v5 = vand.u32 255, %v167_v63 }
  0xec   :  { %v146_v10 = vmul.f32 %v1653_v58, %v145_v6  ;;  %v1570_v6 = vld [vmem:[%s2155_s3 + $0xe8] sm:$0xff]  ;;  %v178_v11 = vcvt.s32.f32 %v172_v4  ;;  %v179_v12 = vcvt.s32.f32 %v173_v5 }
  0xee   :  { %v150_v13 = vsel %vm149_vm12, %v1653_v58, %v146_v10  ;;  %v177_v10 = vcvt.s32.f32 %v171_v3  ;;  %v184_v17 = vpack.c.bf16 %v178_v11, %v178_v11  ;;  %v185_v18 = vpack.c.bf16 %v179_v12, %v179_v12 }
  0xef   :  { %1643 = vpush %v150_v13 }
  0xf0   :  { %v183_v40 = vpack.c.bf16 %v177_v10, %v177_v10 }
 0x120   :  { %s1644_s17 = spop %1643 }
 0x121   :  { %v152_v54 = vstv %s1644_s17 }
 0x122   :  { %v153_v57 = vmul.f32 %v152_v54, %v134_v51  ;;  %v154_v58 = vmul.f32 %v152_v54, %v135_v52  ;;  %v155_v36 = vmul.f32 %v152_v54, %v136_v53  ;;  %v156_v25 = vmul.f32 %v152_v54, %v137_v56  ;;  %v1634_v56 = vld [vmem:[%s2158_s6 + $0x28] sm:$0xff] }
 0x123   :  { %v157_v13 = vmul.f32 %v152_v54, %v138_v9  ;;  %v186_v51 = vpack.c.bf16 %v180_v45, %v180_v45  ;;  %v187_v52 = vpack.c.bf16 %v181_v46, %v181_v46  ;;  %v188_v53 = vpack.c.bf16 %v182_v49, %v182_v49  ;;  %v1636_v54 = vld [vmem:[%s2158_s6 + $0x38] sm:$0xff] }
 0x124   :  { %v1303_v38 = vpack.c.bf16 %v153_v57, %v153_v57  ;;  %v1306_v39 = vpack.c.bf16 %v154_v58, %v154_v58  ;;  %v1309_v59 = vpack.c.bf16 %v155_v36, %v155_v36  ;;  %v1312_v60 = vpack.c.bf16 %v156_v25, %v156_v25  ;;  %v1633_v57 = vld [vmem:[%s2158_s6 + $0x20] sm:$0xff]  ;;  %v1632_v25 = vld [vmem:[%s2158_s6 + $0x18] sm:$0xff] }
 0x125   :  { %v1315_v19 = vpack.c.bf16 %v157_v13, %v157_v13 }
 0x126   :  { %1304 = vmatmul.msk.bf16.vlgmr.msra.gmra.mxu0 %vm2014_vm13, %v1303_v38  ;;  %1307 = vmatmul.msk.bf16.vlgmr.msra.gmra.mxu1 %vm1305_vm14, %v1306_v39 }
 0x127   :  { %1310 = vmatmul.msk.bf16.vlgmr.msra.gmra.mxu2 %vm1308_vm15, %v1309_v59  ;;  %1313 = vmatmul.msk.bf16.vlgmr.msra.gmra.mxu3 %vm1311_vm0, %v1312_v60  ;;  %v1629_v60 = vld [vmem:[%s2158_s6] sm:$0xff] }
 0x128   :  { %1002 = vmatpush.bf16.msra.mxu0 %v1572_v26  ;;  %1015 = vmatpush.bf16.msra.mxu1 %v1580_v27  ;;  %v1630_v27 = vld [vmem:[%s2158_s6 + $0x8] sm:$0xff] }
 0x129   :  { %1028 = vmatpush.bf16.msra.mxu2 %v1588_v61  ;;  %1112 = vmatpush.bf16.msra.mxu3 %v1636_v54 }
 0x12c   :  { %1003 = vmatpush.bf16.msra.mxu0 %v1571_v0  ;;  %1016 = vmatpush.bf16.msra.mxu1 %v1579_v1 }
 0x12d   :  { %1029 = vmatpush.bf16.msra.mxu2 %v1587_v2  ;;  %1113 = vmatpush.bf16.msra.mxu3 %v1635_v55 }
 0x130   :  { %1004 = vmatpush.bf16.msra.mxu0 %v1570_v6  ;;  %1017 = vmatpush.bf16.msra.mxu1 %v1578_v7 }
 0x131   :  { %1030 = vmatpush.bf16.msra.mxu2 %v1586_v8  ;;  %1114 = vmatpush.bf16.msra.mxu3 %v1634_v56 }
 0x134   :  { %1005 = vmatpush.bf16.msra.mxu0 %v1569_v14  ;;  %1018 = vmatpush.bf16.msra.mxu1 %v1577_v15 }
 0x135   :  { %1031 = vmatpush.bf16.msra.mxu2 %v1585_v16  ;;  %1115 = vmatpush.bf16.msra.mxu3 %v1633_v57 }
 0x136   :  { %1316 = vmatmul.msk.bf16.vlgmr.msrb.gmra.mxu0 %vm1314_vm1, %v1315_v19  ;;  %971 = vmatmul.bf16.vlgmr.msrb.gmra.mxu1 %v183_v40  ;;  %v1647_v40 = vld [vmem:[%s2157_s5] ss:$0 sm:$0xff] }
 0x137   :  { %984 = vmatmul.bf16.vlgmr.msrb.gmra.mxu2 %v184_v17  ;;  %997 = vmatmul.bf16.vlgmr.msrb.gmra.mxu3 %v185_v18 }
 0x138   :  { %1006 = vmatpush.bf16.msra.mxu0 %v1568_v20  ;;  %1019 = vmatpush.bf16.msra.mxu1 %v1576_v22 }
 0x139   :  { %1032 = vmatpush.bf16.msra.mxu2 %v1584_v21  ;;  %1116 = vmatpush.bf16.msra.mxu3 %v1632_v25 }
 0x13c   :  { %1007 = vmatpush.bf16.msra.mxu0 %v1567_v28  ;;  %1020 = vmatpush.bf16.msra.mxu1 %v1575_v29 }
 0x13d   :  { %1033 = vmatpush.bf16.msra.mxu2 %v1583_v31  ;;  %1117 = vmatpush.bf16.msra.mxu3 %v1631_v37 }
 0x140   :  { %1008 = vmatpush.bf16.msra.mxu0 %v1566_v41  ;;  %1021 = vmatpush.bf16.msra.mxu1 %v1574_v42 }
 0x141   :  { %1034 = vmatpush.bf16.msra.mxu2 %v1582_v44  ;;  %1118 = vmatpush.bf16.msra.mxu3 %v1630_v27 }
 0x144   :  { %1009 = vmatpush.bf16.msra.mxu0 %v1565_v47  ;;  %1022 = vmatpush.bf16.msra.mxu1 %v1573_v48 }
 0x145   :  { %1035 = vmatpush.bf16.msra.mxu2 %v1581_v50  ;;  %1119 = vmatpush.bf16.msra.mxu3 %v1629_v60 }
 0x147   :  { %1010 = vmatmul.bf16.vlgmr.msra.gmra.mxu0 %v186_v51  ;;  %1023 = vmatmul.bf16.vlgmr.msra.gmra.mxu1 %v187_v52 }
 0x148   :  { %1036 = vmatmul.bf16.vlgmr.msra.gmra.mxu2 %v188_v53 }
 0x1a3   :  { %v619_v58 = vpop.f32.mrf.mxu0  ;;  %v632_v36 = vpop.f32.mrf.mxu1 }
 0x1a4   :  { %v633_v61 = vadd.f32 %v632_v36, %v619_v58 }
 0x1aa   :  { %v645_v38 = vpop.f32.mrf.mxu2  ;;  %v658_v39 = vpop.f32.mrf.mxu3 }
 0x1ab   :  { %v621_v59 = vpop.f32.mrf.mxu0  ;;  %v634_v26 = vpop.f32.mrf.mxu1  ;;  %v646_v1 = vadd.f32 %v645_v38, %v633_v61 }
 0x1ad   :  { %v659_v2 = vadd.f32 %v658_v39, %v646_v1 }
 0x1b2   :  { %v647_v32 = vpop.f32.mrf.mxu2  ;;  %v660_v62 = vpop.f32.mrf.mxu3 }
 0x1b3   :  { %v671_v63 = vpop.f32.mrf.mxu0  ;;  %v972_v0 = vpop.f32.mrf.mxu1 }
 0x1b4   :  { %v672_v3 = vadd.f32 %v671_v63, %v659_v2 }
 0x1b6   :  { %v973_v8 = vadd.f32 %v972_v0, %v672_v3 }
 0x1ba   :  { %v985_v4 = vpop.f32.mrf.mxu2  ;;  %v998_v5 = vpop.f32.mrf.mxu3 }
 0x1bb   :  { %v673_v6 = vpop.f32.mrf.mxu0  ;;  %v974_v7 = vpop.f32.mrf.mxu1  ;;  %v986_v9 = vadd.f32 %v985_v4, %v973_v8 }
 0x1bd   :  { %v999_v12 = vadd.f32 %v998_v5, %v986_v9 }
 0x1c2   :  { %v987_v10 = vpop.f32.mrf.mxu2  ;;  %v1000_v11 = vpop.f32.mrf.mxu3 }
 0x1c4   :  { %v1011_v13 = vpop.f32.mrf.mxu0  ;;  %v1024_v14 = vpop.f32.mrf.mxu1 }
 0x1c5   :  { %v1012_v15 = vadd.f32 %v1011_v13, %v999_v12 }
 0x1c7   :  { %v1025_v16 = vadd.f32 %v1024_v14, %v1012_v15 }
 0x1cb   :  { %v1037_v17 = vpop.f32.mrf.mxu2 }
 0x1cc   :  { %v1038_v18 = vadd.f32 %v1037_v17, %v1025_v16  ;;  %v1013_v19 = vpop.f32.mrf.mxu0  ;;  %v1026_v20 = vpop.f32.mrf.mxu1 }
 0x1ce   :  { %v1045_v22 = vadd.f32 %v1647_v40, %v1038_v18 }
 0x1d0   :  { %v1046_v23 = vmax.f32 %v1045_v22, 0.0 }
 0x1d2   :  { %v1047_v21 = vpack.c.bf16 %v1046_v23, %v1046_v23 }
 0x1d3   :  { %v1039_v34 = vpop.f32.mrf.mxu2 }
 0x1d4   :  { %1120 = vmatmul.bf16.vlgmr.msra.gmra.mxu3 %v1047_v21 }
 0x257   :  { %v1121_v24 = vpop.f32.mrf.mxu3 }
 0x258   :  { %1125 = vst [vmem:[#allocation3] sm:$0xff] %v1121_v24 }
 0x259   :  { %1136 = dma.vmem_to_hbm [thread:$0]  %s1132_s29, 128, %s1134_s10, [#allocation4]  }
 0x25f   :  { %v1123_v28 = vpop.f32.mrf.mxu3 }
 0x260   :  { %1678 = dma.done.wait [#allocation4], 128  }
 0x261   :  { %1679 = vsyncadd [#allocation4], 4294967168 }
 0x262   :  { %1141 = vsyncpa [#allocation4], 1 }

</bundles_post_ra>
